<compile_context>
chip_gen: v7x
topology: tpu7x:2x2x1
jax: 0.10.0
libtpu: 0.0.40
codegen_flags: <defaults>
</compile_context>

<pallas_src>
from functools import partial

import numpy as np
import jax
import jax.numpy as jnp
from jax.experimental import pallas as pl
from jax.experimental.pallas import tpu as pltpu


_F32_TINY = float(np.finfo(np.float32).tiny)


# ----------------------------------------------------------------------------
# STFT basis construction (glue, mirrors tacotron2 stft.py __init__)
# ----------------------------------------------------------------------------
def _hann_periodic(n):
    k = np.arange(n)
    return (0.5 - 0.5 * np.cos(2.0 * np.pi * k / n)).astype(np.float64)


def make_stft_bases(filter_length, hop_length, win_length):
    """Windowed forward Fourier basis and its scaled pseudo-inverse."""
    assert win_length == filter_length
    cutoff = filter_length // 2 + 1
    fourier = np.fft.fft(np.eye(filter_length))
    fourier = np.vstack(
        [np.real(fourier[:cutoff, :]), np.imag(fourier[:cutoff, :])]
    )  # (2*cutoff, filter_length)
    scale = filter_length / hop_length
    inverse = np.linalg.pinv(scale * fourier).T  # (2*cutoff, filter_length)
    window = _hann_periodic(win_length)
    forward = (fourier * window[None, :]).astype(np.float32)
    inverse = (inverse * window[None, :]).astype(np.float32)
    return forward, inverse, cutoff


def window_sumsquare(n_frames, hop_length, win_length, n_fft):
    n = n_fft + hop_length * (n_frames - 1)
    x = np.zeros(n, dtype=np.float64)
    win_sq = _hann_periodic(win_length) ** 2  # pad_center is a no-op (win == n_fft)
    for i in range(n_frames):
        s = i * hop_length
        x[s:min(n, s + n_fft)] += win_sq[: max(0, min(n_fft, n - s))]
    return x.astype(np.float32)


def _round_up(x, m):
    return -(-x // m) * m


def _pick_row_tile(rows):
    """Row tile: multiple of 8, <= 256, and (if possible) >= 2 grid steps."""
    if rows <= 8:
        return 8
    half = _round_up(-(-rows // 2), 8)
    return min(256, half)


# ----------------------------------------------------------------------------
# Pallas kernel: row-tile of frames -> fused STFT -> bias-subtract rescale ->
# fused inverse -> per-frame time-domain contributions.
#   frames (MT, F) @ fwd (F, 2*Cp)  -> spec = [re | im]   (MT, 2*Cp)
#   scale  = max(1 - (bias*strength) * rsqrt(re^2+im^2), 0)
#   [re*scale | im*scale] @ inv (2*Cp, F) -> contrib (MT, F)
# ----------------------------------------------------------------------------
def _denoise_kernel(frames_ref, fwd_ref, inv_ref, bias_ref, out_ref):
    cp = bias_ref.shape[-1]
    x = frames_ref[...]                                                  # (MT, F)
    spec = jnp.dot(x, fwd_ref[...], preferred_element_type=jnp.float32)  # (MT, 2*Cp)
    re = spec[:, :cp]                                                    # lane-aligned
    im = spec[:, cp:]
    inv_mag = jax.lax.rsqrt(jnp.maximum(re * re + im * im, _F32_TINY))   # EUP, finite
    # clamp(mag - bias*strength, 0) * e^{i*phase}  ==  spec * max(1 - bias*strength/mag, 0)
    # (bias_spec is a non-negative magnitude spectrum, so mag==0 bins give 0 either way)
    scale = jnp.maximum(1.0 - bias_ref[...] * inv_mag, 0.0)              # (MT, Cp)
    scaled = jnp.concatenate([re * scale, im * scale], axis=-1)          # (MT, 2*Cp)
    out_ref[...] = jnp.dot(scaled, inv_ref[...],
                           preferred_element_type=jnp.float32)           # (MT, F)


# ----------------------------------------------------------------------------
# Wrapper: framing (shifted-reshape) -> Pallas kernel -> vectorized OLA + norm
# ----------------------------------------------------------------------------
def denoiser_forward(audio, bias_spec, strength, *, fwd_basis, inv_basis, cutoff,
                     filter_length, hop_length, win_length):
    B, num_samples = audio.shape
    F = filter_length
    hop = hop_length
    assert F % 128 == 0 and F % hop == 0
    K = F // hop
    pad = F // 2
    C = cutoff
    Cp = _round_up(C, 128)  # lane-dense spectral axis

    # transform(): reflect pad + framing via K hop-shifted reshaped views (no gather).
    padded = jnp.pad(audio.astype(jnp.float32), ((0, 0), (pad, pad)), mode="reflect")
    L = padded.shape[1]
    T = (L - F) // hop + 1
    ph = padded[:, :(T + K - 1) * hop].reshape(B, T + K - 1, hop)
    frames = jnp.concatenate([ph[:, k:k + T, :] for k in range(K)], axis=-1)  # (B,T,F)

    # Collapse batch*time into the matmul M dimension, tile rows (multiple of 8).
    rows = B * T
    MT = _pick_row_tile(rows)
    rows_pad = _round_up(rows, MT)
    frames = frames.reshape(rows, F)
    if rows_pad != rows:
        frames = jnp.pad(frames, ((0, rows_pad - rows), (0, 0)))

    # Fused, lane-dense (zero-padded to Cp) bases — compile-time numpy constants.
    fwd = np.zeros((F, 2 * Cp), np.float32)
    fwd[:, :C] = fwd_basis[:C].T          # real part
    fwd[:, Cp:Cp + C] = fwd_basis[C:].T   # imag part
    # Fold stft.inverse()'s output scale (filter_length / hop) into the inverse basis.
    out_scale = float(F) / hop
    inv = np.zeros((2 * Cp, F), np.float32)
    inv[:C] = inv_basis[:C] * out_scale
    inv[Cp:Cp + C] = inv_basis[C:] * out_scale

    # strength folded into the (traced) bias vector -> no recompiles across strengths.
    bias_row = jnp.asarray(bias_spec, jnp.float32).reshape(1, C)
    bias_scaled = jnp.pad(bias_row, ((0, 0), (0, Cp - C))) * jnp.asarray(strength, jnp.float32)

    contrib = pl.pallas_call(
        _denoise_kernel,
        out_shape=jax.ShapeDtypeStruct((rows_pad, F), jnp.float32),
        grid_spec=pltpu.PrefetchScalarGridSpec(
            num_scalar_prefetch=0,
            grid=(rows_pad // MT,),
            in_specs=[
                pl.BlockSpec((MT, F), lambda r: (r, 0)),
                pl.BlockSpec((F, 2 * Cp), lambda r: (0, 0)),   # constant block, no re-DMA
                pl.BlockSpec((2 * Cp, F), lambda r: (0, 0)),   # constant block, no re-DMA
                pl.BlockSpec((1, Cp), lambda r: (0, 0)),
            ],
            out_specs=pl.BlockSpec((MT, F), lambda r: (r, 0)),
        ),
        compiler_params=pltpu.CompilerParams(dimension_semantics=("parallel",)),
    )(frames, jnp.asarray(fwd), jnp.asarray(inv), bias_scaled)

    # inverse(): conv_transpose1d(stride=hop) == overlap-add; vectorized pad+sum.
    c = contrib[:rows].reshape(B, T, K, hop)
    ola = sum(jnp.pad(c[:, :, k, :], ((0, 0), (k, K - 1 - k), (0, 0))) for k in range(K))
    out_len = (T + K - 1) * hop  # == F + hop*(T-1)
    out = ola.reshape(B, out_len)

    # window-sum-square normalization as a precomputed reciprocal multiply
    # (matches inverse_transform[..., nonzero] /= window_sum[nonzero]).
    wsum = window_sumsquare(T, hop, win_length, F)
    inv_wsum = np.where(wsum > _F32_TINY, 1.0 / wsum, 1.0).astype(np.float32)
    out = out * jnp.asarray(inv_wsum)[None, :]

    # edge trim (as in stft.inverse).
    out = out[:, pad:out_len - pad]
    return out[:, None, :]  # (B, 1, num_samples), like the PyTorch module


if __name__ == "__main__":
    # Small config consistent with the module (scaled-down STFT).
    filter_length, n_overlap, win_length = 256, 64, 256  # hop = n_overlap
    fwd_basis, inv_basis, cutoff = make_stft_bases(filter_length, n_overlap, win_length)

    key = jax.random.PRNGKey(0)
    k_audio, k_bias = jax.random.split(key)
    B, num_samples = 2, 1024
    audio = jax.random.normal(k_audio, (B, num_samples), jnp.float32) * 0.1
    # Deterministic synthetic stand-in for the vocoder-derived bias spectrum.
    bias_spec = jnp.abs(jax.random.normal(k_bias, (cutoff,), jnp.float32)) * 0.05

    denoise = jax.jit(partial(
        denoiser_forward,
        fwd_basis=fwd_basis, inv_basis=inv_basis, cutoff=cutoff,
        filter_length=filter_length, hop_length=n_overlap, win_length=win_length))

    out = denoise(audio, bias_spec, 0.1)
    jax.block_until_ready(out)
    assert out.shape == (B, 1, num_samples), out.shape
    assert bool(jnp.all(jnp.isfinite(out)))
    print("KERNEL_OK")
</pallas_src>

<mosaic_0001>
module attributes {stable_mosaic.version = 11 : i64} {
  func.func @_denoise_kernel(%arg0: i32, %arg1: memref<24x256xf32, #tpu.memory_space<vmem>>, %arg2: memref<256x512xf32, #tpu.memory_space<vmem>>, %arg3: memref<512x256xf32, #tpu.memory_space<vmem>>, %arg4: memref<1x256xf32, #tpu.memory_space<vmem>>, %arg5: memref<24x256xf32, #tpu.memory_space<vmem>>) attributes {dimension_semantics = [#tpu.dimension_semantics<parallel>], iteration_bounds = array<i64: 2>, scalar_prefetch = 0 : i64, scratch_operands = 0 : i64, tpu.core_type = #tpu.core_type<tc>, window_params = [{transform_indices = @transform_0, window_bounds = array<i64: 24, 256>}, {pipeline_mode = #tpu.pipeline_mode<synchronous>, transform_indices = @transform_1, window_bounds = array<i64: 256, 512>}, {pipeline_mode = #tpu.pipeline_mode<synchronous>, transform_indices = @transform_2, window_bounds = array<i64: 512, 256>}, {pipeline_mode = #tpu.pipeline_mode<synchronous>, transform_indices = @transform_3, window_bounds = array<i64: 1, 256>}, {transform_indices = @transform_4, window_bounds = array<i64: 24, 256>}]} {
    %c0 = arith.constant 0 : index
    %c0_0 = arith.constant 0 : index
    %0 = vector.load %arg1[%c0, %c0_0] : memref<24x256xf32, #tpu.memory_space<vmem>>, vector<24x256xf32>
    %c0_1 = arith.constant 0 : index
    %c0_2 = arith.constant 0 : index
    %1 = vector.load %arg2[%c0_1, %c0_2] : memref<256x512xf32, #tpu.memory_space<vmem>>, vector<256x512xf32>
    %cst = arith.constant dense<0.000000e+00> : vector<24x512xf32>
    %2 = tpu.matmul %0, %1, %cst {dimension_numbers = #tpu.dot_dimension_numbers<[1], [0], [0], [1], [0, 0, 1, 1], [], []>} : vector<24x256xf32>, vector<256x512xf32>, vector<24x512xf32> -> vector<24x512xf32>
    %3 = vector.extract_strided_slice %2 {offsets = [0, 0], sizes = [24, 256], strides = [1, 1]} : vector<24x512xf32> to vector<24x256xf32>
    %4 = vector.extract_strided_slice %2 {offsets = [0, 256], sizes = [24, 256], strides = [1, 1]} : vector<24x512xf32> to vector<24x256xf32>
    %5 = arith.mulf %3, %3 : vector<24x256xf32>
    %6 = arith.mulf %4, %4 : vector<24x256xf32>
    %7 = arith.addf %5, %6 : vector<24x256xf32>
    %cst_3 = arith.constant 1.17549435E-38 : f32
    %8 = vector.broadcast %cst_3 : f32 to vector<24x256xf32>
    %9 = arith.maximumf %7, %8 : vector<24x256xf32>
    %10 = math.rsqrt %9 : vector<24x256xf32>
    %c0_4 = arith.constant 0 : index
    %c0_5 = arith.constant 0 : index
    %11 = vector.load %arg4[%c0_4, %c0_5] : memref<1x256xf32, #tpu.memory_space<vmem>>, vector<1x256xf32>
    %12 = vector.broadcast %11 : vector<1x256xf32> to vector<24x256xf32>
    %13 = arith.mulf %12, %10 : vector<24x256xf32>
    %cst_6 = arith.constant 1.000000e+00 : f32
    %14 = vector.broadcast %cst_6 : f32 to vector<24x256xf32>
    %15 = arith.subf %14, %13 : vector<24x256xf32>
    %cst_7 = arith.constant 0.000000e+00 : f32
    %16 = vector.broadcast %cst_7 : f32 to vector<24x256xf32>
    %17 = arith.maximumf %15, %16 : vector<24x256xf32>
    %18 = arith.mulf %3, %17 : vector<24x256xf32>
    %19 = arith.mulf %4, %17 : vector<24x256xf32>
    %20 = tpu.concatenate %18, %19 in 1 : vector<24x256xf32>, vector<24x256xf32> -> vector<24x512xf32>
    %c0_8 = arith.constant 0 : index
    %c0_9 = arith.constant 0 : index
    %21 = vector.load %arg3[%c0_8, %c0_9] : memref<512x256xf32, #tpu.memory_space<vmem>>, vector<512x256xf32>
    %cst_10 = arith.constant dense<0.000000e+00> : vector<24x256xf32>
    %22 = tpu.matmul %20, %21, %cst_10 {dimension_numbers = #tpu.dot_dimension_numbers<[1], [0], [0], [1], [0, 0, 1, 1], [], []>} : vector<24x512xf32>, vector<512x256xf32>, vector<24x256xf32> -> vector<24x256xf32>
    %c0_11 = arith.constant 0 : index
    %c0_12 = arith.constant 0 : index
    %23 = vector.load %arg5[%c0_11, %c0_12] : memref<24x256xf32, #tpu.memory_space<vmem>>, vector<24x256xf32>
    tpu.vector_store %arg5[%c0_11, %c0_12], %22 {strides = array<i32>} : memref<24x256xf32, #tpu.memory_space<vmem>>, vector<24x256xf32>,
    return
  }
  func.func @transform_0(%arg0: i32) -> (i32, i32) {
    %c0_i32 = arith.constant 0 : i32
    %c0_i32_0 = arith.constant 0 : i32
    return %arg0, %c0_i32 : i32, i32
  }
  func.func @transform_1(%arg0: i32) -> (i32, i32) {
    %c0_i32 = arith.constant 0 : i32
    %c0_i32_0 = arith.constant 0 : i32
    %c0_i32_1 = arith.constant 0 : i32
    return %c0_i32, %c0_i32_0 : i32, i32
  }
  func.func @transform_2(%arg0: i32) -> (i32, i32) {
    %c0_i32 = arith.constant 0 : i32
    %c0_i32_0 = arith.constant 0 : i32
    %c0_i32_1 = arith.constant 0 : i32
    return %c0_i32, %c0_i32_0 : i32, i32
  }
  func.func @transform_3(%arg0: i32) -> (i32, i32) {
    %c0_i32 = arith.constant 0 : i32
    %c0_i32_0 = arith.constant 0 : i32
    %c0_i32_1 = arith.constant 0 : i32
    return %c0_i32, %c0_i32_0 : i32, i32
  }
  func.func @transform_4(%arg0: i32) -> (i32, i32) {
    %c0_i32 = arith.constant 0 : i32
    %c0_i32_0 = arith.constant 0 : i32
    return %arg0, %c0_i32 : i32, i32
  }
}

</mosaic_0001>

<bundles_post_ra>
// kernel: denoiser_forward.1
= control target key start
LH: loop header
LB: loop body
LE: loop exit
PB: predicated region body
PF: predicated region fallthrough
CT: control target
= control target key end

     0   :  { %9 = vsyncpa [#allocation3], 0  ;;  %s1341_s15 = smov 0   ;;  %s1891_s0 = inlined_call_operand.vmem [shape: f32[48,256], index: 0, kind: input, shape index: {}]   ;;  %s1892_s1 = inlined_call_operand.vmem [shape: f32[256,512], index: 1, kind: input, shape index: {}]   ;;  %s1893_s2 = inlined_call_operand.hbm [shape: f32[512,256], index: 2, kind: input, shape index: {}]   ;;  %s1894_s3 = inlined_call_operand.vmem [shape: f32[1,256], index: 3, kind: input, shape index: {}]   ;;  %s1895_s4 = inlined_call_operand.vmem [shape: f32[48,256], index: 4, kind: output, shape index: {}]  }
   0x1 LB: > { %s963_s16 = sadd.s32 4294967295, %s1311_s15   ;;  %p965_p0 = scmp.ge.s32.totalorder %s1311_s15, 1  ;;  %s1311_s15 = sphi %s1341_s15, %s15_s15  }
   0x2   : > { %p135_p1 = scmp.lt.s32.totalorder %s1311_s15, 3  ;;  %s1313_s17 = smov [#allocation2]  }
   0x3   : > { %s150_s18 = sshll.u32 %s1313_s17, 4  ;;  %p1355_p3 = scmp.eq.s32.totalorder %s963_s16, 0  ;;  %s151_s18 = int_to_ptr.vmem [resolvable:$true] %s150_s18 }
   0x4   : > { %p1349_p2 = pnand %p965_p0, %p135_p1  ;;  %s1273_s24 = scalar_lea.hbm %s1893_s2, 16384 }
   0x5   : > { %s1900_s20 = scalar_select %p1355_p3, 1, 0 }
   0x6   : > { %s1899_s19 = scalar_select %p1349_p2, 1, 0 }
   0x7   : > { %p1244_p4 = pneg %p1349_p2  ;;  %p1274_p6 = scmp.ne.s32.totalorder %s1893_s2, %s1273_s24 }
   0x8   : > { %p1280_p10 = scmp.lt.u32.totalorder %s1273_s24, %s1893_s2 }
   0x9   : > { %p1363_p5 = pnand %p1355_p3, %p1244_p4 }
   0xb   : > { %p1275_p7 = pneg %p1363_p5 }
   0xd   : > { %p1276_p8 = pnand %p1275_p7, %p1274_p6 }
   0xf   : > { %p1277_p9 = pneg %p1276_p8 }
  0x11   : > { %p1282_p11 = pnand %p1280_p10, %p1277_p9 }
  0x13   : > { %1285 = shalt.err (!%p1282_p11)
}
  0x14   : > { %s1286_s29 = scalar_lea.vmem %s151_s18, 16384  ;;  %p1294_p1 = scmp.lt.s32.totalorder %s151_s18, %s151_s18 }
  0x15   : > { %p1287_p12 = scmp.ne.s32.totalorder %s151_s18, %s1286_s29  ;;  %p1295_p4 = scmp.lt.s32.totalorder %s1286_s29, %s1286_s29 }
  0x17   : > { %p1289_p13 = pnand %p1287_p12, %p1275_p7  ;;  %p1296_p3 = por %p1295_p4, %p1294_p1 }
  0x19   : > { %p1290_p0 = pneg %p1289_p13 }
  0x1b   : > { %p1297_p2 = pnand %p1296_p3, %p1290_p0 }
  0x1d   : > { %1300 = shalt.err (!%p1297_p2)
}
  0x1e   : > { %s1314_s30 = smov 256   ;;  %s1315_s5 = smov 16  }
  0x1f   : > { %1247 = dma.hbm_to_vmem [thread:$0]  (!%p1363_p5), %s1893_s2, 16384, %s151_s18, [#allocation3], %s1314_s30, %s1314_s30, %s1315_s5  }
  0x20   : > { %p1902_p6 = scmp.ne.s32.totalorder %s1899_s19, 0 }
  0x21   : > { %p1903_p8 = scmp.ne.s32.totalorder (!%p1902_p6), %s1900_s20, 0 }
  0x22   : > { %179 = sbr.rel (%p1902_p6) target bundleno = 699 (0x2bb), region = 36 }
  0x29   : > { %1306 = dma.done.wait (%p1903_p8), [#allocation3], 16384  }
  0x2a   : > { %1308 = vsyncadd (%p1903_p8), [#allocation3], 4294950912  ;;  %v228_v0 = vld [vmem:[%s1892_s1 + $0x8] sm:$0xff]  ;;  %v227_v2 = vld [vmem:[%s1892_s1] sm:$0xff]  ;;  %s207_s30 = smul.u32 3, %s963_s16 }
  0x2b   : > { %v232_v1 = vld [vmem:[%s1892_s1 + $0x28] sm:$0xff]  ;;  %v231_v4 = vld [vmem:[%s1892_s1 + $0x20] sm:$0xff] }
  0x2c   : > { %v978_v3 = vpack.c.bf16 %v232_v1, %v228_v0  ;;  %v236_v5 = vld [vmem:[%s1892_s1 + $0x48] sm:$0xff]  ;;  %v980_v7 = vpack.c.bf16 %v231_v4, %v227_v2  ;;  %v235_v9 = vld [vmem:[%s1892_s1 + $0x40] sm:$0xff]  ;;  %p208_p2 = scmp.lt.s32.totalorder %s207_s30, 5 }
  0x2d   : > { %v240_v6 = vld [vmem:[%s1892_s1 + $0x68] sm:$0xff]  ;;  %v239_v10 = vld [vmem:[%s1892_s1 + $0x60] sm:$0xff] }
  0x2e   : > { %v982_v8 = vpack.c.bf16 %v240_v6, %v236_v5  ;;  %v244_v11 = vld [vmem:[%s1892_s1 + $0x88] sm:$0xff]  ;;  %979 = vmatprep.subr.bf16.mxu1 %v978_v3  ;;  %v984_v13 = vpack.c.bf16 %v239_v10, %v235_v9  ;;  %v243_v15 = vld [vmem:[%s1892_s1 + $0x80] sm:$0xff]  ;;  %s1905_s30 = smov (!%p208_p2, %s207_s30), 5 }
  0x2f   : > { %v248_v12 = vld [vmem:[%s1892_s1 + $0xa8] sm:$0xff]  ;;  %981 = vmatpush1.bf16.msra.mxu1 %v980_v7  ;;  %v247_v16 = vld [vmem:[%s1892_s1 + $0xa0] sm:$0xff]  ;;  %s976_s5 = sshll.u32 %s1905_s30, 4 }
  0x30   : > { %983 = vmatprep.subr.bf16.mxu1 %v982_v8  ;;  %v986_v14 = vpack.c.bf16 %v248_v12, %v244_v11  ;;  %v252_v17 = vld [vmem:[%s1892_s1 + $0xc8] sm:$0xff]  ;;  %v988_v19 = vpack.c.bf16 %v247_v16, %v243_v15  ;;  %v251_v21 = vld [vmem:[%s1892_s1 + $0xc0] sm:$0xff]  ;;  %s1477_s17 = scalar_lea.vmem %s1891_s0, %s976_s5  ;;  %s219_s23 = scalar_lea.vmem %s1895_s4, %s976_s5 }
  0x31   : > { %v256_v18 = vld [vmem:[%s1892_s1 + $0xe8] sm:$0xff]  ;;  %v255_v22 = vld [vmem:[%s1892_s1 + $0xe0] sm:$0xff] }
  0x32   : > { %v990_v20 = vpack.c.bf16 %v256_v18, %v252_v17  ;;  %v260_v23 = vld [vmem:[%s1892_s1 + $0x108] sm:$0xff]  ;;  %v992_v25 = vpack.c.bf16 %v255_v22, %v251_v21  ;;  %v259_v27 = vld [vmem:[%s1892_s1 + $0x100] sm:$0xff] }
  0x33   : > { %985 = vmatpush1.bf16.msra.mxu1 %v984_v13  ;;  %v264_v24 = vld [vmem:[%s1892_s1 + $0x128] sm:$0xff]  ;;  %v263_v28 = vld [vmem:[%s1892_s1 + $0x120] sm:$0xff] }
  0x34   : > { %987 = vmatprep.subr.bf16.mxu1 %v986_v14  ;;  %v994_v26 = vpack.c.bf16 %v264_v24, %v260_v23  ;;  %v268_v29 = vld [vmem:[%s1892_s1 + $0x148] sm:$0xff]  ;;  %v996_v31 = vpack.c.bf16 %v263_v28, %v259_v27  ;;  %v267_v33 = vld [vmem:[%s1892_s1 + $0x140] sm:$0xff] }
  0x35   : > { %v272_v30 = vld [vmem:[%s1892_s1 + $0x168] sm:$0xff]  ;;  %v271_v34 = vld [vmem:[%s1892_s1 + $0x160] sm:$0xff] }
  0x36   : > { %v998_v32 = vpack.c.bf16 %v272_v30, %v268_v29  ;;  %v276_v35 = vld [vmem:[%s1892_s1 + $0x188] sm:$0xff]  ;;  %v1000_v37 = vpack.c.bf16 %v271_v34, %v267_v33  ;;  %v275_v39 = vld [vmem:[%s1892_s1 + $0x180] sm:$0xff]  ;;  %v234_v33 = vld [vmem:[%s1892_s1 + $0x38] sm:$0xff] }
  0x37   : > { %989 = vmatpush1.bf16.msra.mxu1 %v988_v19  ;;  %v280_v36 = vld [vmem:[%s1892_s1 + $0x1a8] sm:$0xff]  ;;  %v279_v40 = vld [vmem:[%s1892_s1 + $0x1a0] sm:$0xff] }
  0x38   : > { %991 = vmatprep.subr.bf16.mxu1 %v990_v20  ;;  %v1002_v38 = vpack.c.bf16 %v280_v36, %v276_v35  ;;  %v1486_v41 = vld [vmem:[%s1477_s17 + $0x8] sm:$0xff]  ;;  %v1004_v44 = vpack.c.bf16 %v279_v40, %v275_v39  ;;  %v283_v46 = vld [vmem:[%s1892_s1 + $0x1c0] sm:$0xff]  ;;  %v229_v36 = vld [vmem:[%s1892_s1 + $0x10] sm:$0xff] }
  0x39   : > { %v284_v42 = vld [vmem:[%s1892_s1 + $0x1c8] sm:$0xff]  ;;  %419 = vmatprep.mubr.f32.mxu1 %v1486_v41  ;;  %v287_v47 = vld [vmem:[%s1892_s1 + $0x1e0] sm:$0xff]  ;;  %v242_v39 = vld [vmem:[%s1892_s1 + $0x78] sm:$0xff] }
  0x3a   : > { %v288_v43 = vld [vmem:[%s1892_s1 + $0x1e8] sm:$0xff]  ;;  %v1008_v50 = vpack.c.bf16 %v287_v47, %v283_v46  ;;  %v291_v52 = vld [vmem:[%s1892_s1 + $0x200] sm:$0xff]  ;;  %v1625_v46 = vld [vmem:[%s1477_s17 + $0x18] sm:$0xff] }
  0x3b   : > { %993 = vmatpush1.bf16.msra.mxu1 %v992_v25  ;;  %v1006_v45 = vpack.c.bf16 %v288_v43, %v284_v42  ;;  %v292_v48 = vld [vmem:[%s1892_s1 + $0x208] sm:$0xff]  ;;  %v295_v53 = vld [vmem:[%s1892_s1 + $0x220] sm:$0xff]  ;;  %v246_v47 = vld [vmem:[%s1892_s1 + $0x98] sm:$0xff] }
  0x3c   : > { %995 = vmatprep.subr.bf16.mxu1 %v994_v26  ;;  %v296_v49 = vld [vmem:[%s1892_s1 + $0x228] sm:$0xff]  ;;  %v1012_v56 = vpack.c.bf16 %v295_v53, %v291_v52  ;;  %v299_v58 = vld [vmem:[%s1892_s1 + $0x240] sm:$0xff]  ;;  %v245_v52 = vld [vmem:[%s1892_s1 + $0x90] sm:$0xff] }
  0x3d   : > { %v1010_v51 = vpack.c.bf16 %v296_v49, %v292_v48  ;;  %v300_v54 = vld [vmem:[%s1892_s1 + $0x248] sm:$0xff]  ;;  %v303_v59 = vld [vmem:[%s1892_s1 + $0x260] sm:$0xff]  ;;  %v250_v48 = vld [vmem:[%s1892_s1 + $0xb8] sm:$0xff] }
  0x3e   : > { %v304_v55 = vld [vmem:[%s1892_s1 + $0x268] sm:$0xff]  ;;  %v1016_v62 = vpack.c.bf16 %v303_v59, %v299_v58  ;;  %v307_v0 = vld [vmem:[%s1892_s1 + $0x280] sm:$0xff]  ;;  %v249_v53 = vld [vmem:[%s1892_s1 + $0xb0] sm:$0xff] }
  0x3f   : > { %997 = vmatpush1.bf16.msra.mxu1 %v996_v31  ;;  %v1014_v57 = vpack.c.bf16 %v304_v55, %v300_v54  ;;  %v308_v60 = vld [vmem:[%s1892_s1 + $0x288] sm:$0xff]  ;;  %v311_v1 = vld [vmem:[%s1892_s1 + $0x2a0] sm:$0xff]  ;;  %v254_v55 = vld [vmem:[%s1892_s1 + $0xd8] sm:$0xff] }
  0x40   : > { %999 = vmatprep.subr.bf16.mxu1 %v998_v32  ;;  %v312_v61 = vld [vmem:[%s1892_s1 + $0x2a8] sm:$0xff]  ;;  %v1020_v4 = vpack.c.bf16 %v311_v1, %v307_v0  ;;  %v315_v6 = vld [vmem:[%s1892_s1 + $0x2c0] sm:$0xff]  ;;  %v230_v32 = vld [vmem:[%s1892_s1 + $0x18] sm:$0xff] }
  0x41   : > { %v1018_v63 = vpack.c.bf16 %v312_v61, %v308_v60  ;;  %v316_v2 = vld [vmem:[%s1892_s1 + $0x2c8] sm:$0xff]  ;;  %v319_v7 = vld [vmem:[%s1892_s1 + $0x2e0] sm:$0xff]  ;;  %v1042_v35 = vpack.c.bf16 %v234_v33, %v230_v32  ;;  %v253_v60 = vld [vmem:[%s1892_s1 + $0xd0] sm:$0xff] }
  0x42   : > { %v320_v3 = vld [vmem:[%s1892_s1 + $0x2e8] sm:$0xff]  ;;  %v1024_v10 = vpack.c.bf16 %v319_v7, %v315_v6  ;;  %v323_v12 = vld [vmem:[%s1892_s1 + $0x300] sm:$0xff]  ;;  %v257_v61 = vld [vmem:[%s1892_s1 + $0xf0] sm:$0xff] }
  0x43   : > { %1001 = vmatpush1.bf16.msra.mxu1 %v1000_v37  ;;  %v1022_v5 = vpack.c.bf16 %v320_v3, %v316_v2  ;;  %v324_v8 = vld [vmem:[%s1892_s1 + $0x308] sm:$0xff]  ;;  %v327_v13 = vld [vmem:[%s1892_s1 + $0x320] sm:$0xff]  ;;  %v233_v37 = vld [vmem:[%s1892_s1 + $0x30] sm:$0xff]  ;;  %v1056_v0 = vpack.c.bf16 %v257_v61, %v253_v60 }
  0x44   : > { %1003 = vmatprep.subr.bf16.mxu1 %v1002_v38  ;;  %v328_v9 = vld [vmem:[%s1892_s1 + $0x328] sm:$0xff]  ;;  %v1028_v16 = vpack.c.bf16 %v327_v13, %v323_v12  ;;  %v331_v18 = vld [vmem:[%s1892_s1 + $0x340] sm:$0xff]  ;;  %v238_v38 = vld [vmem:[%s1892_s1 + $0x58] sm:$0xff]  ;;  %v1044_v42 = vpack.c.bf16 %v233_v37, %v229_v36 }
  0x45   : > { %v1026_v11 = vpack.c.bf16 %v328_v9, %v324_v8  ;;  %v332_v14 = vld [vmem:[%s1892_s1 + $0x348] sm:$0xff]  ;;  %v335_v19 = vld [vmem:[%s1892_s1 + $0x360] sm:$0xff]  ;;  %v1046_v43 = vpack.c.bf16 %v242_v39, %v238_v38  ;;  %v261_v2 = vld [vmem:[%s1892_s1 + $0x110] sm:$0xff] }
  0x46   : > { %v336_v15 = vld [vmem:[%s1892_s1 + $0x368] sm:$0xff]  ;;  %v1032_v22 = vpack.c.bf16 %v335_v19, %v331_v18  ;;  %v339_v24 = vld [vmem:[%s1892_s1 + $0x380] sm:$0xff]  ;;  %v265_v3 = vld [vmem:[%s1892_s1 + $0x130] sm:$0xff] }
  0x47   : > { %1005 = vmatpush1.bf16.msra.mxu1 %v1004_v44  ;;  %v1030_v17 = vpack.c.bf16 %v336_v15, %v332_v14  ;;  %v340_v20 = vld [vmem:[%s1892_s1 + $0x388] sm:$0xff]  ;;  %v343_v25 = vld [vmem:[%s1892_s1 + $0x3a0] sm:$0xff]  ;;  %v237_v44 = vld [vmem:[%s1892_s1 + $0x50] sm:$0xff] }
  0x48   : > { %1007 = vmatprep.subr.bf16.mxu1 %v1006_v45  ;;  %v344_v21 = vld [vmem:[%s1892_s1 + $0x3a8] sm:$0xff]  ;;  %v1036_v28 = vpack.c.bf16 %v343_v25, %v339_v24  ;;  %v347_v30 = vld [vmem:[%s1892_s1 + $0x3c0] sm:$0xff]  ;;  %v241_v45 = vld [vmem:[%s1892_s1 + $0x70] sm:$0xff] }
  0x49   : > { %v1034_v23 = vpack.c.bf16 %v344_v21, %v340_v20  ;;  %v348_v26 = vld [vmem:[%s1892_s1 + $0x3c8] sm:$0xff]  ;;  %v351_v31 = vld [vmem:[%s1892_s1 + $0x3e0] sm:$0xff]  ;;  %v1048_v49 = vpack.c.bf16 %v241_v45, %v237_v44  ;;  %v269_v7 = vld [vmem:[%s1892_s1 + $0x150] sm:$0xff] }
  0x4a   : > { %v352_v27 = vld [vmem:[%s1892_s1 + $0x3e8] sm:$0xff]  ;;  %v1040_v34 = vpack.c.bf16 %v351_v31, %v347_v30  ;;  %v1616_v40 = vld [vmem:[%s1477_s17] sm:$0xff]  ;;  %v273_v8 = vld [vmem:[%s1892_s1 + $0x170] sm:$0xff] }
  0x4b   : > { %1009 = vmatpush1.bf16.msra.mxu1 %v1008_v50  ;;  %v1038_v29 = vpack.c.bf16 %v352_v27, %v348_v26  ;;  %v1636_v50 = vld [vmem:[%s1477_s17 + $0x10] sm:$0xff]  ;;  %v1645_v54 = vld [vmem:[%s1477_s17 + $0x28] sm:$0xff]  ;;  %v1656_v58 = vld [vmem:[%s1477_s17 + $0x20] sm:$0xff] }
  0x4c   : > { %1011 = vmatprep.subr.bf16.mxu1 %v1010_v51  ;;  %v1050_v51 = vpack.c.bf16 %v250_v48, %v246_v47  ;;  %v278_v9 = vld [vmem:[%s1892_s1 + $0x198] sm:$0xff]  ;;  %v277_v13 = vld [vmem:[%s1892_s1 + $0x190] sm:$0xff] }
  0x4d   : > { %v281_v14 = vld [vmem:[%s1892_s1 + $0x1b0] sm:$0xff]  ;;  %v286_v15 = vld [vmem:[%s1892_s1 + $0x1d8] sm:$0xff] }
  0x4e   : > { %v285_v19 = vld [vmem:[%s1892_s1 + $0x1d0] sm:$0xff]  ;;  %v294_v21 = vld [vmem:[%s1892_s1 + $0x218] sm:$0xff] }
  0x4f   : > { %1013 = vmatpush1.bf16.msra.mxu1 %v1012_v56  ;;  %v258_v56 = vld [vmem:[%s1892_s1 + $0xf8] sm:$0xff]  ;;  %v289_v20 = vld [vmem:[%s1892_s1 + $0x1f0] sm:$0xff] }
  0x50   : > { %1015 = vmatprep.subr.bf16.mxu1 %v1014_v57  ;;  %v1052_v57 = vpack.c.bf16 %v249_v53, %v245_v52  ;;  %v1054_v59 = vpack.c.bf16 %v258_v56, %v254_v55  ;;  %v293_v25 = vld [vmem:[%s1892_s1 + $0x210] sm:$0xff]  ;;  %v302_v27 = vld [vmem:[%s1892_s1 + $0x258] sm:$0xff] }
  0x51   : > { %v297_v26 = vld [vmem:[%s1892_s1 + $0x230] sm:$0xff]  ;;  %v310_v33 = vld [vmem:[%s1892_s1 + $0x298] sm:$0xff] }
  0x52   : > { %v301_v31 = vld [vmem:[%s1892_s1 + $0x250] sm:$0xff]  ;;  %v318_v39 = vld [vmem:[%s1892_s1 + $0x2d8] sm:$0xff] }
  0x53   : > { %1017 = vmatpush1.bf16.msra.mxu1 %v1016_v62  ;;  %v262_v62 = vld [vmem:[%s1892_s1 + $0x118] sm:$0xff]  ;;  %v305_v32 = vld [vmem:[%s1892_s1 + $0x270] sm:$0xff] }
  0x54   : > { %1019 = vmatprep.subr.bf16.mxu1 %v1018_v63  ;;  %v266_v63 = vld [vmem:[%s1892_s1 + $0x138] sm:$0xff]  ;;  %v309_v37 = vld [vmem:[%s1892_s1 + $0x290] sm:$0xff] }
  0x55   : > { %v1058_v1 = vpack.c.bf16 %v266_v63, %v262_v62  ;;  %v313_v38 = vld [vmem:[%s1892_s1 + $0x2b0] sm:$0xff]  ;;  %v326_v48 = vld [vmem:[%s1892_s1 + $0x318] sm:$0xff] }
  0x56   : > { %v317_v45 = vld [vmem:[%s1892_s1 + $0x2d0] sm:$0xff]  ;;  %v334_v56 = vld [vmem:[%s1892_s1 + $0x358] sm:$0xff] }
  0x57   : > { %1021 = vmatpush1.bf16.msra.mxu1 %v1020_v4  ;;  %v270_v4 = vld [vmem:[%s1892_s1 + $0x158] sm:$0xff]  ;;  %v321_v47 = vld [vmem:[%s1892_s1 + $0x2f0] sm:$0xff] }
  0x58   : > { %1023 = vmatprep.subr.bf16.mxu1 %v1022_v5  ;;  %v274_v5 = vld [vmem:[%s1892_s1 + $0x178] sm:$0xff]  ;;  %v325_v53 = vld [vmem:[%s1892_s1 + $0x310] sm:$0xff] }
  0x59   : > { %v1062_v6 = vpack.c.bf16 %v274_v5, %v270_v4  ;;  %v329_v55 = vld [vmem:[%s1892_s1 + $0x330] sm:$0xff]  ;;  %v342_v63 = vld [vmem:[%s1892_s1 + $0x398] sm:$0xff] }
  0x5a   : > { %v333_v61 = vld [vmem:[%s1892_s1 + $0x350] sm:$0xff]  ;;  %v350_v5 = vld [vmem:[%s1892_s1 + $0x3d8] sm:$0xff] }
  0x5b   : > { %1025 = vmatpush1.bf16.msra.mxu1 %v1024_v10  ;;  %v282_v10 = vld [vmem:[%s1892_s1 + $0x1b8] sm:$0xff]  ;;  %v337_v62 = vld [vmem:[%s1892_s1 + $0x370] sm:$0xff] }
  0x5c   : > { %1027 = vmatprep.subr.bf16.mxu1 %v1026_v11  ;;  %v1064_v11 = vpack.c.bf16 %v273_v8, %v269_v7  ;;  %v1066_v12 = vpack.c.bf16 %v282_v10, %v278_v9  ;;  %v345_v4 = vld [vmem:[%s1892_s1 + $0x3b0] sm:$0xff] }
  0x5d   : > { %v349_v8 = vld [vmem:[%s1892_s1 + $0x3d0] sm:$0xff] }
  0x5e   : > { %v353_v9 = vld [vmem:[%s1892_s1 + $0x3f0] sm:$0xff] }
  0x5f   : > { %1029 = vmatpush1.bf16.msra.mxu1 %v1028_v16  ;;  %v290_v16 = vld [vmem:[%s1892_s1 + $0x1f8] sm:$0xff]  ;;  %v1104_v10 = vpack.c.bf16 %v353_v9, %v349_v8 }
  0x60   : > { %1031 = vmatprep.subr.bf16.mxu1 %v1030_v17  ;;  %v1068_v17 = vpack.c.bf16 %v281_v14, %v277_v13  ;;  %v1070_v18 = vpack.c.bf16 %v290_v16, %v286_v15  ;;  %v593_v13 = vld [vmem:[#allocation2] sm:$0xff]  ;;  %v595_v15 = vld [vmem:[#allocation2 + $0x10] sm:$0xff]  ;;  %v598_v16 = vld [vmem:[#allocation2 + $0x28] sm:$0xff] }
  0x61   : > { %v636_v8 = vld [vmem:[#allocation2 + $0x158] sm:$0xff] }
  0x63   : > { %1033 = vmatpush1.bf16.msra.mxu1 %v1032_v22  ;;  %v298_v22 = vld [vmem:[%s1892_s1 + $0x238] sm:$0xff] }
  0x64   : > { %1035 = vmatprep.subr.bf16.mxu1 %v1034_v23  ;;  %v1072_v23 = vpack.c.bf16 %v289_v20, %v285_v19  ;;  %v1074_v24 = vpack.c.bf16 %v298_v22, %v294_v21  ;;  %v597_v20 = vld [vmem:[#allocation2 + $0x20] sm:$0xff]  ;;  %v599_v21 = vld [vmem:[#allocation2 + $0x30] sm:$0xff] }
  0x65   : > { %v601_v22 = vld [vmem:[#allocation2 + $0x40] sm:$0xff] }
  0x67   : > { %1037 = vmatpush1.bf16.msra.mxu1 %v1036_v28  ;;  %v306_v28 = vld [vmem:[%s1892_s1 + $0x278] sm:$0xff] }
  0x68   : > { %1039 = vmatprep.subr.bf16.mxu1 %v1038_v29  ;;  %v1076_v29 = vpack.c.bf16 %v297_v26, %v293_v25  ;;  %v1078_v30 = vpack.c.bf16 %v306_v28, %v302_v27  ;;  %v605_v27 = vld [vmem:[#allocation2 + $0x60] sm:$0xff]  ;;  %v607_v28 = vld [vmem:[#allocation2 + $0x70] sm:$0xff] }
  0x6b   : > { %1041 = vmatpush1.bf16.msra.mxu1 %v1040_v34  ;;  %v314_v34 = vld [vmem:[%s1892_s1 + $0x2b8] sm:$0xff] }
  0x6c   : > { %1043 = vmatprep.subr.bf16.mxu1 %v1042_v35  ;;  %v1080_v35 = vpack.c.bf16 %v305_v32, %v301_v31  ;;  %v1082_v36 = vpack.c.bf16 %v314_v34, %v310_v33  ;;  %v1120_v31 = vpack.c.bf16 %v607_v28, %v605_v27  ;;  %v609_v33 = vld [vmem:[#allocation2 + $0x80] sm:$0xff]  ;;  %v611_v34 = vld [vmem:[#allocation2 + $0x90] sm:$0xff]  ;;  %v652_v27 = vld [vmem:[#allocation2 + $0x1d8] sm:$0xff] }
  0x6e   : > { %420 = vmatmul.mubr.f32.vlgmr.msra.gmra.mrb[0].mxu1 %v1616_v40 }
  0x6f   : > { %1045 = vmatpush1.bf16.msra.mxu1 %v1044_v42  ;;  %425 = vmatprep.mubr.f32.mxu1 %v1625_v46  ;;  %v322_v42 = vld [vmem:[%s1892_s1 + $0x2f8] sm:$0xff] }
  0x70   : > { %1047 = vmatprep.subr.bf16.mxu1 %v1046_v43  ;;  %v1084_v43 = vpack.c.bf16 %v313_v38, %v309_v37  ;;  %v1086_v44 = vpack.c.bf16 %v322_v42, %v318_v39  ;;  %v1124_v37 = vpack.c.bf16 %v611_v34, %v609_v33  ;;  %v613_v39 = vld [vmem:[#allocation2 + $0xa0] sm:$0xff]  ;;  %v615_v42 = vld [vmem:[#allocation2 + $0xb0] sm:$0xff]  ;;  %v656_v33 = vld [vmem:[#allocation2 + $0x1f8] sm:$0xff] }
  0x72   : > { %426 = vmatmul.mubr.f32.gmra.mrb[2].mxu1 %v1636_v50 }
  0x73   : > { %1049 = vmatpush1.bf16.msra.mxu1 %v1048_v49  ;;  %431 = vmatprep.mubr.f32.mxu1 %v1645_v54  ;;  %v330_v49 = vld [vmem:[%s1892_s1 + $0x338] sm:$0xff] }
  0x74   : > { %1051 = vmatprep.subr.bf16.mxu1 %v1050_v51  ;;  %v1088_v51 = vpack.c.bf16 %v321_v47, %v317_v45  ;;  %v1090_v52 = vpack.c.bf16 %v330_v49, %v326_v48  ;;  %v1128_v45 = vpack.c.bf16 %v615_v42, %v613_v39  ;;  %v617_v48 = vld [vmem:[#allocation2 + $0xc0] sm:$0xff]  ;;  %v619_v49 = vld [vmem:[#allocation2 + $0xd0] sm:$0xff]  ;;  %v660_v39 = vld [vmem:[#allocation2 + $0x218] sm:$0xff] }
  0x76   : > { %432 = vmatmul.mubr.f32.gmra.mrb[4].mxu1 %v1656_v58 }
  0x77   : > { %1053 = vmatpush1.bf16.msra.mxu1 %v1052_v57  ;;  %502 = vmatprep.mubr.f32.mxu1 %v1486_v41  ;;  %v1060_v41 = vpack.c.bf16 %v265_v3, %v261_v2  ;;  %v338_v57 = vld [vmem:[%s1892_s1 + $0x378] sm:$0xff]  ;;  %v341_v3 = vld [vmem:[%s1892_s1 + $0x390] sm:$0xff] }
  0x78   : > { %1055 = vmatprep.subr.bf16.mxu1 %v1054_v59  ;;  %v1092_v59 = vpack.c.bf16 %v329_v55, %v325_v53  ;;  %v1094_v60 = vpack.c.bf16 %v338_v57, %v334_v56  ;;  %v1132_v53 = vpack.c.bf16 %v619_v49, %v617_v48  ;;  %v621_v56 = vld [vmem:[#allocation2 + $0xe0] sm:$0xff]  ;;  %v623_v57 = vld [vmem:[#allocation2 + $0xf0] sm:$0xff] }
  0x7b   : > { %1057 = vmatpush1.bf16.msra.mxu1 %v1056_v0  ;;  %v346_v0 = vld [vmem:[%s1892_s1 + $0x3b8] sm:$0xff] }
  0x7c   : > { %1059 = vmatprep.subr.bf16.mxu1 %v1058_v1  ;;  %v1096_v1 = vpack.c.bf16 %v337_v62, %v333_v61  ;;  %v1098_v2 = vpack.c.bf16 %v346_v0, %v342_v63  ;;  %v1136_v61 = vpack.c.bf16 %v623_v57, %v621_v56  ;;  %v625_v63 = vld [vmem:[#allocation2 + $0x100] sm:$0xff]  ;;  %v627_v0 = vld [vmem:[#allocation2 + $0x110] sm:$0xff]  ;;  %v553_v57 = vlaneseq }
  0x7f   : > { %1061 = vmatpush1.bf16.msra.mxu1 %v1060_v41  ;;  %v354_v41 = vld [vmem:[%s1892_s1 + $0x3f8] sm:$0xff] }
  0x80   : > { %1063 = vmatprep.subr.bf16.mxu1 %v1062_v6  ;;  %v1100_v6 = vpack.c.bf16 %v345_v4, %v341_v3  ;;  %v1102_v7 = vpack.c.bf16 %v354_v41, %v350_v5  ;;  %v1140_v3 = vpack.c.bf16 %v627_v0, %v625_v63  ;;  %v629_v5 = vld [vmem:[#allocation2 + $0x120] sm:$0xff]  ;;  %v631_v41 = vld [vmem:[#allocation2 + $0x130] sm:$0xff] }
  0x83   : > { %1065 = vmatpush1.bf16.msra.mxu1 %v1064_v11  ;;  %v594_v11 = vld [vmem:[#allocation2 + $0x8] sm:$0xff] }
  0x84   : > { %1067 = vmatprep.subr.bf16.mxu1 %v1066_v12  ;;  %v596_v12 = vld [vmem:[#allocation2 + $0x18] sm:$0xff] }
  0x85   : > { %v1106_v14 = vpack.c.bf16 %v596_v12, %v594_v11  ;;  %v635_v11 = vld [vmem:[#allocation2 + $0x150] sm:$0xff] }
  0x87   : > { %1069 = vmatpush1.bf16.msra.mxu1 %v1068_v17  ;;  %v600_v17 = vld [vmem:[#allocation2 + $0x38] sm:$0xff]  ;;  %1107 = vmatprep.subr.bf16.mxu0 %v1106_v14 }
  0x88   : > { %1071 = vmatprep.subr.bf16.mxu1 %v1070_v18  ;;  %v1108_v18 = vpack.c.bf16 %v595_v15, %v593_v13  ;;  %v1110_v19 = vpack.c.bf16 %v600_v17, %v598_v16  ;;  %v638_v13 = vld [vmem:[#allocation2 + $0x168] sm:$0xff]  ;;  %v640_v14 = vld [vmem:[#allocation2 + $0x178] sm:$0xff]  ;;  %v637_v16 = vld [vmem:[#allocation2 + $0x160] sm:$0xff] }
  0x89   : > { %v1150_v15 = vpack.c.bf16 %v640_v14, %v638_v13  ;;  %v639_v17 = vld [vmem:[#allocation2 + $0x170] sm:$0xff] }
  0x8a   : > { %1109 = vmatpush1.bf16.msra.mxu0 %v1108_v18  ;;  %v1152_v18 = vpack.c.bf16 %v639_v17, %v637_v16  ;;  %v551_v17 = vld [vmem:[%s1894_s3] sm:$0x3] }
  0x8b   : > { %1073 = vmatpush1.bf16.msra.mxu1 %v1072_v23  ;;  %1111 = vmatprep.subr.bf16.mxu0 %v1110_v19  ;;  %v606_v23 = vld [vmem:[#allocation2 + $0x68] sm:$0xff] }
  0x8c   : > { %1075 = vmatprep.subr.bf16.mxu1 %v1074_v24  ;;  %v608_v24 = vld [vmem:[#allocation2 + $0x78] sm:$0xff]  ;;  %v642_v19 = vld [vmem:[#allocation2 + $0x188] sm:$0xff] }
  0x8d   : > { %v1118_v26 = vpack.c.bf16 %v608_v24, %v606_v23  ;;  %v645_v23 = vld [vmem:[#allocation2 + $0x1a0] sm:$0xff]  ;;  %v647_v24 = vld [vmem:[#allocation2 + $0x1b0] sm:$0xff] }
  0x8f   : > { %1077 = vmatpush1.bf16.msra.mxu1 %v1076_v29  ;;  %v610_v29 = vld [vmem:[#allocation2 + $0x88] sm:$0xff] }
  0x90   : > { %1079 = vmatprep.subr.bf16.mxu1 %v1078_v30  ;;  %v612_v30 = vld [vmem:[#allocation2 + $0x98] sm:$0xff] }
  0x91   : > { %v1122_v32 = vpack.c.bf16 %v612_v30, %v610_v29  ;;  %v649_v29 = vld [vmem:[#allocation2 + $0x1c0] sm:$0xff]  ;;  %v651_v30 = vld [vmem:[#allocation2 + $0x1d0] sm:$0xff] }
  0x93   : > { %1081 = vmatpush1.bf16.msra.mxu1 %v1080_v35  ;;  %v614_v35 = vld [vmem:[#allocation2 + $0xa8] sm:$0xff] }
  0x94   : > { %1083 = vmatprep.subr.bf16.mxu1 %v1082_v36  ;;  %v616_v36 = vld [vmem:[#allocation2 + $0xb8] sm:$0xff] }
  0x95   : > { %v1126_v38 = vpack.c.bf16 %v616_v36, %v614_v35  ;;  %v653_v35 = vld [vmem:[#allocation2 + $0x1e0] sm:$0xff]  ;;  %v655_v36 = vld [vmem:[#allocation2 + $0x1f0] sm:$0xff] }
  0x97   : > { %1085 = vmatpush1.bf16.msra.mxu1 %v1084_v43  ;;  %v618_v43 = vld [vmem:[#allocation2 + $0xc8] sm:$0xff] }
  0x98   : > { %1087 = vmatprep.subr.bf16.mxu1 %v1086_v44  ;;  %v620_v44 = vld [vmem:[#allocation2 + $0xd8] sm:$0xff] }
  0x99   : > { %v1130_v47 = vpack.c.bf16 %v620_v44, %v618_v43 }
  0x9b   : > { %1089 = vmatpush1.bf16.msra.mxu1 %v1088_v51  ;;  %v622_v51 = vld [vmem:[#allocation2 + $0xe8] sm:$0xff] }
  0x9c   : > { %1091 = vmatprep.subr.bf16.mxu1 %v1090_v52  ;;  %v624_v52 = vld [vmem:[#allocation2 + $0xf8] sm:$0xff] }
  0x9d   : > { %v1134_v55 = vpack.c.bf16 %v624_v52, %v622_v51 }
  0x9f   : > { %1093 = vmatpush1.bf16.msra.mxu1 %v1092_v59  ;;  %v626_v59 = vld [vmem:[#allocation2 + $0x108] sm:$0xff] }
  0xa0   : > { %1095 = vmatprep.subr.bf16.mxu1 %v1094_v60  ;;  %v628_v60 = vld [vmem:[#allocation2 + $0x118] sm:$0xff] }
  0xa1   : > { %v1138_v62 = vpack.c.bf16 %v628_v60, %v626_v59 }
  0xa3   : > { %1097 = vmatpush1.bf16.msra.mxu1 %v1096_v1  ;;  %v630_v1 = vld [vmem:[#allocation2 + $0x128] sm:$0xff] }
  0xa4   : > { %1099 = vmatprep.subr.bf16.mxu1 %v1098_v2  ;;  %v632_v2 = vld [vmem:[#allocation2 + $0x138] sm:$0xff] }
  0xa5   : > { %v1142_v4 = vpack.c.bf16 %v632_v2, %v630_v1 }
  0xa7   : > { %1101 = vmatpush1.bf16.msra.mxu1 %v1100_v6  ;;  %v1144_v6 = vpack.c.bf16 %v631_v41, %v629_v5 }
  0xa8   : > { %1103 = vmatprep.subr.bf16.mxu1 %v1102_v7  ;;  %v634_v7 = vld [vmem:[#allocation2 + $0x148] sm:$0xff] }
  0xa9   : > { %v1146_v9 = vpack.c.bf16 %v636_v8, %v634_v7 }
  0xab   : > { %1105 = vmatpush1.bf16.msra.mxu1 %v1104_v10  ;;  %v633_v10 = vld [vmem:[#allocation2 + $0x140] sm:$0xff] }
  0xac   : > { %v1148_v12 = vpack.c.bf16 %v635_v11, %v633_v10 }
  0xae   : > { %503 = vmatmul.mubr.f32.vlgmr.msra.gmra.mrb[6].mxu1 %v1616_v40  ;;  %v602_v40 = vld [vmem:[#allocation2 + $0x48] sm:$0xff] }
  0xaf   : > { %508 = vmatprep.mubr.f32.mxu1 %v1625_v46  ;;  %v604_v46 = vld [vmem:[#allocation2 + $0x58] sm:$0xff] }
  0xb2   : > { %509 = vmatmul.mubr.f32.gmra.mrb[8].mxu1 %v1636_v50  ;;  %v1112_v50 = vpack.c.bf16 %v599_v21, %v597_v20  ;;  %v644_v20 = vld [vmem:[#allocation2 + $0x198] sm:$0xff] }
  0xb3   : > { %514 = vmatprep.mubr.f32.mxu1 %v1645_v54  ;;  %v1114_v54 = vpack.c.bf16 %v604_v46, %v602_v40  ;;  %v1154_v21 = vpack.c.bf16 %v644_v20, %v642_v19  ;;  %v641_v40 = vld [vmem:[#allocation2 + $0x180] sm:$0xff]  ;;  %v643_v46 = vld [vmem:[#allocation2 + $0x190] sm:$0xff] }
  0xb4   : > { %1113 = vmatpush1.bf16.msra.mxu0 %v1112_v50  ;;  %v1156_v50 = vpack.c.bf16 %v643_v46, %v641_v40 }
  0xb5   : > { %1115 = vmatprep.subr.bf16.mxu0 %v1114_v54  ;;  %v646_v54 = vld [vmem:[#allocation2 + $0x1a8] sm:$0xff] }
  0xb6   : > { %515 = vmatmul.mubr.f32.gmra.mrb[10].mxu1 %v1656_v58  ;;  %v603_v58 = vld [vmem:[#allocation2 + $0x50] sm:$0xff] }
  0xb7   : > { %v1116_v25 = vpack.c.bf16 %v603_v58, %v601_v22  ;;  %v648_v22 = vld [vmem:[#allocation2 + $0x1b8] sm:$0xff] }
  0xb8   : > { %v1158_v58 = vpack.c.bf16 %v648_v22, %v646_v54 }
  0xb9   : > { %1117 = vmatpush1.bf16.msra.mxu0 %v1116_v25  ;;  %v1160_v25 = vpack.c.bf16 %v647_v24, %v645_v23 }
  0xba   : > { %1119 = vmatprep.subr.bf16.mxu0 %v1118_v26  ;;  %v650_v26 = vld [vmem:[#allocation2 + $0x1c8] sm:$0xff] }
  0xbb   : > { %v1162_v28 = vpack.c.bf16 %v652_v27, %v650_v26 }
  0xbd   : > { %1121 = vmatpush1.bf16.msra.mxu0 %v1120_v31  ;;  %v1164_v31 = vpack.c.bf16 %v651_v30, %v649_v29  ;;  %v657_v30 = vld [vmem:[#allocation2 + $0x200] sm:$0xff] }
  0xbe   : > { %1123 = vmatprep.subr.bf16.mxu0 %v1122_v32  ;;  %v654_v32 = vld [vmem:[#allocation2 + $0x1e8] sm:$0xff] }
  0xbf   : > { %v1166_v34 = vpack.c.bf16 %v656_v33, %v654_v32 }
  0xc1   : > { %1125 = vmatpush1.bf16.msra.mxu0 %v1124_v37  ;;  %v1168_v37 = vpack.c.bf16 %v655_v36, %v653_v35  ;;  %v664_v35 = vld [vmem:[#allocation2 + $0x238] sm:$0xff] }
  0xc2   : > { %1127 = vmatprep.subr.bf16.mxu0 %v1126_v38  ;;  %v658_v38 = vld [vmem:[#allocation2 + $0x208] sm:$0xff] }
  0xc3   : > { %v1170_v42 = vpack.c.bf16 %v660_v39, %v658_v38 }
  0xc5   : > { %1129 = vmatpush1.bf16.msra.mxu0 %v1128_v45 }
  0xc6   : > { %1131 = vmatprep.subr.bf16.mxu0 %v1130_v47 }
  0xc9   : > { %1133 = vmatpush1.bf16.msra.mxu0 %v1132_v53 }
  0xca   : > { %1135 = vmatprep.subr.bf16.mxu0 %v1134_v55 }
  0xcd   : > { %1137 = vmatpush1.bf16.msra.mxu0 %v1136_v61 }
  0xce   : > { %1139 = vmatprep.subr.bf16.mxu0 %v1138_v62 }
  0xd1   : > { %1141 = vmatpush1.bf16.msra.mxu0 %v1140_v3 }
  0xd2   : > { %1143 = vmatprep.subr.bf16.mxu0 %v1142_v4  ;;  %v554_v4 = vshrl.u32 %v553_v57, 7 }
  0xd4   : > { %v555_v14 = vsub.s32 0, %v554_v4 }
  0xd5   : > { %1145 = vmatpush1.bf16.msra.mxu0 %v1144_v6 }
  0xd6   : > { %1147 = vmatprep.subr.bf16.mxu0 %v1146_v9  ;;  %v556_v40 = vrot.slane %v551_v17, %v555_v14 }
  0xd9   : > { %1149 = vmatpush1.bf16.msra.mxu0 %v1148_v12 }
  0xda   : > { %1151 = vmatprep.subr.bf16.mxu0 %v1150_v15 }
  0xdd   : > { %1153 = vmatpush1.bf16.msra.mxu0 %v1152_v18  ;;  %v559_v18 = vsub.s32 1, %v554_v4  ;;  %v668_v4 = vld [vmem:[#allocation2 + $0x258] sm:$0xff] }
  0xde   : > { %1155 = vmatprep.subr.bf16.mxu0 %v1154_v21 }
  0xe1   : > { %1157 = vmatpush1.bf16.msra.mxu0 %v1156_v50  ;;  %v560_v50 = vrot.slane %v551_v17, %v559_v18 }
  0xe2   : > { %1159 = vmatprep.subr.bf16.mxu0 %v1158_v58 }
  0xe5   : > { %1161 = vmatpush1.bf16.msra.mxu0 %v1160_v25 }
  0xe6   : > { %1163 = vmatprep.subr.bf16.mxu0 %v1162_v28 }
  0xe9   : > { %1165 = vmatpush1.bf16.msra.mxu0 %v1164_v31  ;;  %v659_v31 = vld [vmem:[#allocation2 + $0x210] sm:$0xff] }
  0xea   : > { %1167 = vmatprep.subr.bf16.mxu0 %v1166_v34  ;;  %v662_v34 = vld [vmem:[#allocation2 + $0x228] sm:$0xff] }
  0xed   : > { %1169 = vmatpush1.bf16.msra.mxu0 %v1168_v37 }
  0xee   : > { %1171 = vmatprep.subr.bf16.mxu0 %v1170_v42 }
 0x141   : > { %v1815_v43 = vpop.f32.mrb[0].mxu1 }
 0x142   : > { %v1817_v44 = vpop.f32.mrb[1].mxu1  ;;  %v521_v52 = vmul.f32 %v1815_v43, %v1815_v43 }
 0x143   : > { %v522_v56 = vmul.f32 %v1817_v44, %v1817_v44 }
 0x145   : > { %v1819_v45 = vpop.f32.mrb[2].mxu1 }
 0x146   : > { %v1821_v47 = vpop.f32.mrb[3].mxu1  ;;  %v523_v63 = vmul.f32 %v1819_v45, %v1819_v45 }
 0x147   : > { %v524_v3 = vmul.f32 %v1821_v47, %v1821_v47 }
 0x149   : > { %v1823_v48 = vpop.f32.mrb[4].mxu1 }
 0x14a   : > { %v1825_v49 = vpop.f32.mrb[5].mxu1  ;;  %v525_v9 = vmul.f32 %v1823_v48, %v1823_v48 }
 0x14b   : > { %v526_v13 = vmul.f32 %v1825_v49, %v1825_v49 }
 0x181   : > { %v504_v51 = vpop.f32.mrb[6].mxu1 }
 0x182   : > { %v527_v53 = vmul.f32 %v504_v51, %v504_v51  ;;  %v506_v55 = vpop.f32.mrb[7].mxu1 }
 0x183   : > { %v528_v59 = vmul.f32 %v506_v55, %v506_v55 }
 0x184   : > { %v533_v60 = vadd.f32 %v527_v53, %v521_v52 }
 0x185   : > { %v534_v61 = vadd.f32 %v528_v59, %v522_v56  ;;  %v1831_v62 = vpop.f32.mrb[8].mxu1  ;;  %v1172_v56 = vpack.c.bf16 %v659_v31, %v657_v30  ;;  %v686_v30 = vld [vmem:[#allocation2 + $0x2e8] sm:$0xff]  ;;  %v688_v31 = vld [vmem:[#allocation2 + $0x2f8] sm:$0xff] }
 0x186   : > { %v539_v0 = vmax.f32 %v533_v60, 1.1754944e-38  ;;  %v529_v1 = vmul.f32 %v1831_v62, %v1831_v62  ;;  %v1837_v2 = vpop.f32.mrb[9].mxu1 }
 0x187   : > { %v540_v5 = vmax.f32 %v534_v61, 1.1754944e-38  ;;  %v530_v41 = vmul.f32 %v1837_v2, %v1837_v2  ;;  %v1174_v61 = vpack.c.bf16 %v664_v35, %v662_v34  ;;  %v685_v34 = vld [vmem:[#allocation2 + $0x2e0] sm:$0xff]  ;;  %v687_v35 = vld [vmem:[#allocation2 + $0x2f0] sm:$0xff] }
 0x188   : > { %1261 = vrsqrt.f32 %v539_v0  ;;  %v535_v6 = vadd.f32 %v529_v1, %v523_v63  ;;  %v661_v63 = vld [vmem:[#allocation2 + $0x220] sm:$0xff]  ;;  %v663_v0 = vld [vmem:[#allocation2 + $0x230] sm:$0xff] }
 0x189   : > { %1263 = vrsqrt.f32 %v540_v5  ;;  %v536_v7 = vadd.f32 %v530_v41, %v524_v3  ;;  %v1843_v8 = vpop.f32.mrb[10].mxu1 }
 0x18a   : > { %v541_v10 = vmax.f32 %v535_v6, 1.1754944e-38  ;;  %v531_v11 = vmul.f32 %v1843_v8, %v1843_v8  ;;  %v1849_v12 = vpop.f32.mrb[11].mxu1 }
 0x18b   : > { %v542_v15 = vmax.f32 %v536_v7, 1.1754944e-38  ;;  %v532_v16 = vmul.f32 %v1849_v12, %v1849_v12  ;;  %v1176_v7 = vpack.c.bf16 %v663_v0, %v661_v63  ;;  %v695_v63 = vld [vmem:[#allocation2 + $0x330] sm:$0xff]  ;;  %v698_v0 = vld [vmem:[#allocation2 + $0x348] sm:$0xff] }
 0x18c   : > { %1265 = vrsqrt.f32 %v541_v10  ;;  %v537_v19 = vadd.f32 %v531_v11, %v525_v9  ;;  %v665_v11 = vld [vmem:[#allocation2 + $0x240] sm:$0xff] }
 0x18d   : > { %1267 = vrsqrt.f32 %v542_v15  ;;  %v538_v20 = vadd.f32 %v532_v16, %v526_v13  ;;  %v667_v13 = vld [vmem:[#allocation2 + $0x250] sm:$0xff]  ;;  %v672_v15 = vld [vmem:[#allocation2 + $0x278] sm:$0xff] }
 0x18e   : > { %v543_v21 = vmax.f32 %v537_v19, 1.1754944e-38  ;;  %v1180_v17 = vpack.c.bf16 %v667_v13, %v665_v11  ;;  %v669_v19 = vld [vmem:[#allocation2 + $0x260] sm:$0xff]  ;;  %v706_v11 = vld [vmem:[#allocation2 + $0x388] sm:$0xff]  ;;  %v708_v13 = vld [vmem:[#allocation2 + $0x398] sm:$0xff] }
 0x18f   : > { %v544_v46 = vmax.f32 %v538_v20, 1.1754944e-38  ;;  %v671_v20 = vld [vmem:[#allocation2 + $0x270] sm:$0xff] }
 0x190   : > { %1269 = vrsqrt.f32 %v543_v21  ;;  %v674_v21 = vld [vmem:[#allocation2 + $0x288] sm:$0xff] }
 0x191   : > { %1271 = vrsqrt.f32 %v544_v46  ;;  %v673_v46 = vld [vmem:[#allocation2 + $0x280] sm:$0xff] }
 0x192   : > { %v1262_v54 = vpop.eup %1261 }
 0x193   : > { %v1264_v22 = vpop.eup %1263  ;;  %v563_v58 = vmul.f32 %v1262_v54, %v556_v40  ;;  %v680_v54 = vld [vmem:[#allocation2 + $0x2b8] sm:$0xff] }
 0x194   : > { %v564_v23 = vmul.f32 %v1264_v22, %v560_v50 }
 0x195   : > { %v569_v24 = vsub.f32 1.0, %v563_v58  ;;  %v677_v58 = vld [vmem:[#allocation2 + $0x2a0] sm:$0xff] }
 0x196   : > { %v1266_v25 = vpop.eup %1265  ;;  %v570_v26 = vsub.f32 1.0, %v564_v23  ;;  %v679_v23 = vld [vmem:[#allocation2 + $0x2b0] sm:$0xff] }
 0x197   : > { %v1268_v27 = vpop.eup %1267  ;;  %v575_v28 = vmax.f32 %v569_v24, 0.0  ;;  %v565_v29 = vmul.f32 %v1266_v25, %v556_v40  ;;  %v682_v24 = vld [vmem:[#allocation2 + $0x2c8] sm:$0xff]  ;;  %v684_v25 = vld [vmem:[#allocation2 + $0x2d8] sm:$0xff] }
 0x198   : > { %v576_v32 = vmax.f32 %v570_v26, 0.0  ;;  %v566_v33 = vmul.f32 %v1268_v27, %v560_v50  ;;  %v1192_v26 = vpack.c.bf16 %v679_v23, %v677_v58  ;;  %v1194_v27 = vpack.c.bf16 %v684_v25, %v682_v24  ;;  %v717_v23 = vld [vmem:[#allocation2 + $0x3e0] sm:$0xff]  ;;  %v719_v24 = vld [vmem:[#allocation2 + $0x3f0] sm:$0xff] }
 0x199   : > { %v1858_v36 = vmul.f32 %v575_v28, %v504_v51  ;;  %v571_v37 = vsub.f32 1.0, %v565_v29  ;;  %v581_v38 = vmul.f32 %v575_v28, %v1815_v43  ;;  %v666_v51 = vld [vmem:[#allocation2 + $0x248] sm:$0xff]  ;;  %v681_v28 = vld [vmem:[#allocation2 + $0x2c0] sm:$0xff]  ;;  %v683_v29 = vld [vmem:[#allocation2 + $0x2d0] sm:$0xff]  ;;  %v1232_v25 = vpack.c.bf16 %v719_v24, %v717_v23 }
 0x19a   : > { %v1270_v39 = vpop.eup %1269  ;;  %v588_v42 = vmul.f32 %v576_v32, %v506_v55  ;;  %v572_v52 = vsub.f32 1.0, %v566_v33  ;;  %v582_v53 = vmul.f32 %v576_v32, %v1817_v44  ;;  %v1178_v10 = vpack.c.bf16 %v668_v4, %v666_v51  ;;  %v697_v4 = vld [vmem:[#allocation2 + $0x340] sm:$0xff] }
 0x19b   : > { %v1272_v57 = vpop.eup %1271  ;;  %v577_v59 = vmax.f32 %v571_v37, 0.0  ;;  %v567_v60 = vmul.f32 %v1270_v39, %v556_v40  ;;  %v676_v40 = vld [vmem:[#allocation2 + $0x298] sm:$0xff]  ;;  %v1196_v32 = vpack.c.bf16 %v683_v29, %v681_v28  ;;  %v1198_v33 = vpack.c.bf16 %v688_v31, %v686_v30  ;;  %v690_v37 = vld [vmem:[#allocation2 + $0x308] sm:$0xff] }
 0x19c   : > { %v578_v1 = vmax.f32 %v572_v52, 0.0  ;;  %v568_v3 = vmul.f32 %v1272_v57, %v560_v50  ;;  %785 = vmatprep.mubr.f32.mxu0 %v582_v53  ;;  %v678_v50 = vld [vmem:[#allocation2 + $0x2a8] sm:$0xff]  ;;  %v1200_v39 = vpack.c.bf16 %v687_v35, %v685_v34  ;;  %v689_v52 = vld [vmem:[#allocation2 + $0x300] sm:$0xff]  ;;  %v691_v53 = vld [vmem:[#allocation2 + $0x310] sm:$0xff] }
 0x19d   : > { %v1863_v5 = vmul.f32 %v577_v59, %v1831_v62  ;;  %v573_v43 = vsub.f32 1.0, %v567_v60  ;;  %786 = vmatmul.mubr.f32.vlgmr.msra.gmra.mrb[0].mxu0 %v581_v38  ;;  %v583_v55 = vmul.f32 %v577_v59, %v1819_v45  ;;  %v670_v62 = vld [vmem:[#allocation2 + $0x268] sm:$0xff]  ;;  %v1190_v22 = vpack.c.bf16 %v680_v54, %v678_v50  ;;  %v692_v38 = vld [vmem:[#allocation2 + $0x318] sm:$0xff]  ;;  %v715_v50 = vld [vmem:[#allocation2 + $0x3d0] sm:$0xff] }
 0x19e   : > { %v1867_v44 = vmul.f32 %v578_v1, %v1837_v2  ;;  %v574_v41 = vsub.f32 1.0, %v568_v3  ;;  %1173 = vmatpush1.bf16.msra.mxu0 %v1172_v56  ;;  %v584_v6 = vmul.f32 %v578_v1, %v1821_v47  ;;  %v1182_v18 = vpack.c.bf16 %v672_v15, %v670_v62  ;;  %v694_v56 = vld [vmem:[#allocation2 + $0x328] sm:$0xff]  ;;  %v696_v57 = vld [vmem:[#allocation2 + $0x338] sm:$0xff]  ;;  %v705_v15 = vld [vmem:[#allocation2 + $0x380] sm:$0xff] }
 0x19f   : > { %v579_v9 = vmax.f32 %v573_v43, 0.0  ;;  %1175 = vmatprep.subr.bf16.mxu0 %v1174_v61  ;;  %v1204_v59 = vpack.c.bf16 %v691_v53, %v689_v52  ;;  %v1206_v60 = vpack.c.bf16 %v696_v57, %v694_v56  ;;  %v693_v61 = vld [vmem:[#allocation2 + $0x320] sm:$0xff]  ;;  %v700_v1 = vld [vmem:[#allocation2 + $0x358] sm:$0xff]  ;;  %v699_v43 = vld [vmem:[#allocation2 + $0x350] sm:$0xff]  ;;  %v1218_v62 = vpack.c.bf16 %v708_v13, %v706_v11 }
 0x1a0   : > { %v580_v14 = vmax.f32 %v574_v41, 0.0  ;;  %791 = vmatprep.mubr.f32.mxu0 %v584_v6  ;;  %v1208_v3 = vpack.c.bf16 %v695_v63, %v693_v61  ;;  %v1210_v51 = vpack.c.bf16 %v700_v1, %v698_v0  ;;  %v704_v41 = vld [vmem:[#allocation2 + $0x378] sm:$0xff]  ;;  %v1212_v6 = vpack.c.bf16 %v699_v43, %v697_v4  ;;  %v718_v54 = vld [vmem:[#allocation2 + $0x3e8] sm:$0xff] }
 0x1a1   : > { %v1871_v16 = vmul.f32 %v579_v9, %v1843_v8  ;;  %792 = vmatmul.mubr.f32.gmra.mrb[2].mxu0 %v583_v55  ;;  %v585_v45 = vmul.f32 %v579_v9, %v1823_v48  ;;  %v1184_v8 = vpack.c.bf16 %v671_v20, %v669_v19  ;;  %v1186_v48 = vpack.c.bf16 %v676_v40, %v674_v21  ;;  %v702_v55 = vld [vmem:[#allocation2 + $0x368] sm:$0xff]  ;;  %v701_v9 = vld [vmem:[#allocation2 + $0x360] sm:$0xff]  ;;  %v711_v21 = vld [vmem:[#allocation2 + $0x3b0] sm:$0xff] }
 0x1a2   : > { %v1875_v2 = vmul.f32 %v580_v14, %v1849_v12  ;;  %1177 = vmatpush1.bf16.msra.mxu0 %v1176_v7  ;;  %v586_v47 = vmul.f32 %v580_v14, %v1825_v49  ;;  %v675_v12 = vld [vmem:[#allocation2 + $0x290] sm:$0xff]  ;;  %v1214_v7 = vpack.c.bf16 %v704_v41, %v702_v55  ;;  %v709_v20 = vld [vmem:[#allocation2 + $0x3a0] sm:$0xff]  ;;  %v714_v40 = vld [vmem:[#allocation2 + $0x3c8] sm:$0xff] }
 0x1a3   : > { %1179 = vmatprep.subr.bf16.mxu0 %v1178_v10  ;;  %v1188_v49 = vpack.c.bf16 %v675_v12, %v673_v46  ;;  %v703_v10 = vld [vmem:[#allocation2 + $0x370] sm:$0xff]  ;;  %v713_v12 = vld [vmem:[#allocation2 + $0x3c0] sm:$0xff] }
 0x1a4   : > { %797 = vmatprep.mubr.f32.mxu0 %v586_v47  ;;  %v1216_v14 = vpack.c.bf16 %v703_v10, %v701_v9  ;;  %v710_v47 = vld [vmem:[#allocation2 + $0x3a8] sm:$0xff] }
 0x1a5   : > { %798 = vmatmul.mubr.f32.gmra.mrb[4].mxu0 %v585_v45  ;;  %v707_v45 = vld [vmem:[#allocation2 + $0x390] sm:$0xff] }
 0x1a6   : > { %1181 = vmatpush1.bf16.msra.mxu0 %v1180_v17  ;;  %868 = vmatprep.mubr.f32.mxu0 %v588_v42  ;;  %v1202_v42 = vpack.c.bf16 %v692_v38, %v690_v37  ;;  %v712_v17 = vld [vmem:[#allocation2 + $0x3b8] sm:$0xff] }
 0x1a7   : > { %1183 = vmatprep.subr.bf16.mxu0 %v1182_v18  ;;  %v1220_v18 = vpack.c.bf16 %v707_v45, %v705_v15  ;;  %v1222_v19 = vpack.c.bf16 %v712_v17, %v710_v47 }
 0x1aa   : > { %1185 = vmatpush1.bf16.msra.mxu0 %v1184_v8  ;;  %v716_v8 = vld [vmem:[#allocation2 + $0x3d8] sm:$0xff] }
 0x1ab   : > { %1187 = vmatprep.subr.bf16.mxu0 %v1186_v48  ;;  %v1224_v48 = vpack.c.bf16 %v711_v21, %v709_v20  ;;  %v1226_v46 = vpack.c.bf16 %v716_v8, %v714_v40 }
 0x1ae   : > { %1189 = vmatpush1.bf16.msra.mxu0 %v1188_v49  ;;  %v720_v49 = vld [vmem:[#allocation2 + $0x3f8] sm:$0xff] }
 0x1af   : > { %1191 = vmatprep.subr.bf16.mxu0 %v1190_v22  ;;  %v1228_v22 = vpack.c.bf16 %v715_v50, %v713_v12  ;;  %v1230_v58 = vpack.c.bf16 %v720_v49, %v718_v54 }
 0x1b2   : > { %1193 = vmatpush1.bf16.msra.mxu0 %v1192_v26 }
 0x1b3   : > { %1195 = vmatprep.subr.bf16.mxu0 %v1194_v27 }
 0x1b6   : > { %1197 = vmatpush1.bf16.msra.mxu0 %v1196_v32 }
 0x1b7   : > { %1199 = vmatprep.subr.bf16.mxu0 %v1198_v33 }
 0x1ba   : > { %1201 = vmatpush1.bf16.msra.mxu0 %v1200_v39 }
 0x1bb   : > { %1203 = vmatprep.subr.bf16.mxu0 %v1202_v42 }
 0x1be   : > { %1205 = vmatpush1.bf16.msra.mxu0 %v1204_v59 }
 0x1bf   : > { %1207 = vmatprep.subr.bf16.mxu0 %v1206_v60 }
 0x1c2   : > { %1209 = vmatpush1.bf16.msra.mxu0 %v1208_v3 }
 0x1c3   : > { %1211 = vmatprep.subr.bf16.mxu0 %v1210_v51 }
 0x1c6   : > { %1213 = vmatpush1.bf16.msra.mxu0 %v1212_v6 }
 0x1c7   : > { %1215 = vmatprep.subr.bf16.mxu0 %v1214_v7 }
 0x1ca   : > { %1217 = vmatpush1.bf16.msra.mxu0 %v1216_v14 }
 0x1cb   : > { %1219 = vmatprep.subr.bf16.mxu0 %v1218_v62 }
 0x1ce   : > { %1221 = vmatpush1.bf16.msra.mxu0 %v1220_v18 }
 0x1cf   : > { %1223 = vmatprep.subr.bf16.mxu0 %v1222_v19 }
 0x1d2   : > { %1225 = vmatpush1.bf16.msra.mxu0 %v1224_v48 }
 0x1d3   : > { %1227 = vmatprep.subr.bf16.mxu0 %v1226_v46 }
 0x1d6   : > { %1229 = vmatpush1.bf16.msra.mxu0 %v1228_v22 }
 0x1d7   : > { %1231 = vmatprep.subr.bf16.mxu0 %v1230_v58 }
 0x1da   : > { %1233 = vmatpush1.bf16.msra.mxu0 %v1232_v25 }
 0x1dd   : > { %869 = vmatmul.mubr.f32.vlgmr.msra.gmra.mrb[0].mxu0 %v1858_v36 }
 0x1de   : > { %874 = vmatprep.mubr.f32.mxu0 %v1867_v44 }
 0x1e1   : > { %875 = vmatmul.mubr.f32.gmra.mrb[2].mxu0 %v1863_v5 }
 0x1e2   : > { %880 = vmatprep.mubr.f32.mxu0 %v1875_v2 }
 0x1e5   : > { %881 = vmatmul.mubr.f32.gmra.mrb[4].mxu0 %v1871_v16 }
 0x2b0   : > { %v870_v26 = vpop.f32.mrb[0].mxu0 }
 0x2b1   : > { %887 = vst [vmem:[%s219_s23] sm:$0xff] %v870_v26  ;;  %v872_v27 = vpop.f32.mrb[1].mxu0 }
 0x2b2   : > { %888 = vst [vmem:[%s219_s23 + $0x8] sm:$0xff] %v872_v27 }
 0x2b4   : > { %v876_v28 = vpop.f32.mrb[2].mxu0 }
 0x2b5   : > { %889 = vst [vmem:[%s219_s23 + $0x10] sm:$0xff] %v876_v28  ;;  %v878_v36 = vpop.f32.mrb[3].mxu0 }
 0x2b6   : > { %890 = vst [vmem:[%s219_s23 + $0x18] sm:$0xff] %v878_v36 }
 0x2b8   : > { %v882_v44 = vpop.f32.mrb[4].mxu0 }
 0x2b9   : > { %891 = vst [vmem:[%s219_s23 + $0x20] sm:$0xff] %v882_v44  ;;  %v884_v5 = vpop.f32.mrb[5].mxu0 }
 0x2ba   : > { %892 = vst [vmem:[%s219_s23 + $0x28] sm:$0xff] %v884_v5 }
 0x2bb PF: > { %s15_s15 = sadd.s32 1, %s1311_s15  }
 0x2bc   : > { %p12_p3 = scmp.ge.s32.totalorder %s15_s15, 4  }
 0x2be   :  { %14 = sbr.rel (!%p12_p3) target bundleno = 1 (0x1), region = 71 }
 0x2c5   :  { %917 = vsyncpa [#allocation3], 1 }
 0x2c6   :  { %919 = vsyncpa [#allocation3 + $0x1], 1 }

</bundles_post_ra>
